<compile_context>
chip_gen: v6e
topology: v6e:2x2x1
jax: 0.10.0
libtpu: 0.0.40
codegen_flags: <defaults>
</compile_context>

<pallas_src>
import functools

import numpy as np
import jax
import jax.numpy as jnp
from jax.experimental import pallas as pl
from jax.experimental.pallas import tpu as pltpu

CODES = {"A": 0, "T": 3, "G": 1, "C": 2, "N": 4}
ID2NT = {0: "A", 1: "G", 2: "C", 3: "T", 4: "N"}

# Exact PyTorch semantics (float 0.25 truncated into the int64 one-hot tensor).
N_FILL = 0.0

_LANE = 128  # TPU lane width; sequence-axis tiles are multiples of this.

# ASCII -> nucleotide-id LUT.  Invalid characters map to -1 so we can raise
# KeyError just like CODES[n.upper()] would.
_ASCII_LUT = np.full(256, -1, dtype=np.int8)
for _nt, _cid in CODES.items():
    _ASCII_LUT[ord(_nt)] = _cid
    _ASCII_LUT[ord(_nt.lower())] = _cid


def n2id(n):
    return CODES[n.upper()]


def _round_up(x, m):
    return ((x + m - 1) // m) * m


@functools.lru_cache(maxsize=1)
def _device_tile_lanes():
    """Generation-specific default lane tile (see perf notes at top of file)."""
    try:
        kind = jax.devices()[0].device_kind.lower()
    except Exception:
        return 64 * 1024
    if "v7" in kind:
        return 256 * 1024
    if "v6" in kind or "trillium" in kind or "v5p" in kind:
        return 128 * 1024
    return 64 * 1024  # v5e / v4 / unknown — safe everywhere


def _make_kernel(n_fill):
    """Build the kernel body, specializing the 'N' fill value at trace time."""
    fill = float(n_fill)

    def kernel(codes_ref, out_ref):
        # codes_ref : VMEM (1, TL) int8    -- nucleotide ids in {0..4} (4 = 'N' / pad)
        # out_ref   : VMEM (4, TL) f32/bf16 -- one-hot, channels-first
        codes = codes_ref[...].astype(jnp.int32)          # (1, TL)
        for ch in range(4):                               # A, G, C, T channels
            row = jnp.where(codes == ch, 1.0, 0.0)        # (1, TL) f32
            if fill != 0.0:
                # Documented-intent path: every channel = fill at 'N' positions.
                row = jnp.where(codes == 4, fill, row)
            out_ref[pl.ds(ch, 1), :] = row.astype(out_ref.dtype)

    return kernel


def _pick_tile(L, tile_lanes=None):
    """Lane tile + number of grid steps for a length-L sequence."""
    if tile_lanes is not None:
        tl = _round_up(int(tile_lanes), _LANE)
    else:
        tl = min(_round_up(max(L, 1), _LANE), _device_tile_lanes())
    n_tiles = max(1, pl.cdiv(L, tl))
    return tl, n_tiles


@functools.partial(
    jax.jit, static_argnames=("n_fill", "tl", "n_tiles", "out_len", "out_dtype")
)
def _seq2tensor_device(codes_p, *, n_fill, tl, n_tiles, out_len, out_dtype):
    # VMEM budget: 128 * tl bytes for the double-buffered in/out blocks
    # (32*tl per buffer each, see header), plus headroom for intermediates.
    vmem_limit = int(min(max(128 * tl + (8 << 20), 16 << 20), 60 << 20))
    return pl.pallas_call(
        _make_kernel(n_fill),
        out_shape=jax.ShapeDtypeStruct((4, out_len), out_dtype),
        grid=(n_tiles,),
        in_specs=[pl.BlockSpec((1, tl), lambda i: (0, i))],   # int8 codes tile
        out_specs=pl.BlockSpec((4, tl), lambda i: (0, i)),    # one-hot tile (ragged last block masked)
        compiler_params=pltpu.CompilerParams(
            dimension_semantics=("parallel",),
            vmem_limit_bytes=vmem_limit,
        ),
    )(codes_p)


def seq2tensor(seq, n_fill=N_FILL, out_dtype=jnp.float32, tile_lanes=None):
    """JAX/Pallas equivalent of Seq2Tensor.forward.

    `seq`: Python string of nucleotides, or an already-encoded float array
    (pass-through, coerced to float32 — mirrors the torch.FloatTensor branch).
    Returns an array of shape (4, len(seq)) in `out_dtype` (default float32;
    bf16 is exact for {0, 1, 0.25} and halves writeback bytes).
    `tile_lanes` overrides the per-generation lane tile (mainly for tests).
    """
    # Pass-through branch (host glue).
    if isinstance(seq, (np.ndarray, jax.Array)) and jnp.issubdtype(
        jnp.result_type(seq), jnp.floating
    ):
        return jnp.asarray(seq, dtype=jnp.float32)

    L = len(seq)
    out_dtype = np.dtype(out_dtype)
    if L == 0:
        return jnp.zeros((4, 0), dtype=out_dtype)

    # Host-side glue: vectorized string -> int8 codes via ASCII LUT.
    ascii_bytes = np.frombuffer(seq.encode("ascii"), dtype=np.uint8)
    ids = _ASCII_LUT[ascii_bytes]
    if np.any(ids < 0):
        bad = seq[int(np.argmax(ids < 0))]
        raise KeyError(bad)  # same error class as CODES[n.upper()]

    tl, n_tiles = _pick_tile(L, tile_lanes)
    L_pad = tl * n_tiles
    codes_p = np.full((1, L_pad), 4, dtype=np.int8)  # pad with 'N'; masked on output
    codes_p[0, :L] = ids

    return _seq2tensor_device(
        jnp.asarray(codes_p),
        n_fill=float(n_fill),
        tl=tl,
        n_tiles=n_tiles,
        out_len=L,
        out_dtype=out_dtype,
    )


def _reference_numpy(seq, n_fill=N_FILL):
    """Pure-numpy replica of the exact PyTorch forward semantics."""
    codes = np.array([n2id(x) for x in seq], dtype=np.int64)
    onehot = np.eye(5, dtype=np.float32)[codes][:, :4]
    onehot[codes == 4] = float(n_fill)  # 0.0 default == int64-truncation behavior
    return onehot.T                     # transpose(0, 1) -> (4, L)


if __name__ == "__main__":
    key = jax.random.PRNGKey(0)
    k1, k2 = jax.random.split(key)

    # Small deterministic example: length-40 sequence.
    ids1 = np.asarray(jax.random.randint(k1, (40,), 0, 5))
    seq1 = "".join(ID2NT[int(i)] for i in ids1)
    out1 = jax.block_until_ready(seq2tensor(seq1))
    ref1 = _reference_numpy(seq1)
    assert out1.shape == (4, 40), out1.shape
    assert out1.dtype == jnp.float32
    np.testing.assert_array_equal(np.asarray(out1), ref1)

    # Multi-tile path + ragged final output block (forced small 128-lane tile).
    ids2 = np.asarray(jax.random.randint(k2, (300,), 0, 5))
    seq2 = "".join(ID2NT[int(i)] for i in ids2)
    out2 = jax.block_until_ready(seq2tensor(seq2, tile_lanes=128))
    np.testing.assert_array_equal(np.asarray(out2), _reference_numpy(seq2))

    # Documented-intent fill (0.25) with bf16 output (exact in bf16).
    out3 = jax.block_until_ready(seq2tensor(seq1, n_fill=0.25, out_dtype=jnp.bfloat16))
    np.testing.assert_array_equal(
        np.asarray(out3).astype(np.float32), _reference_numpy(seq1, n_fill=0.25)
    )

    # Float pass-through branch (mirrors `isinstance(seq, torch.FloatTensor)`).
    pt = seq2tensor(np.asarray(ref1, dtype=np.float64))
    assert pt.shape == ref1.shape and pt.dtype == jnp.float32

    print("KERNEL_OK")
</pallas_src>

<mosaic_0001>
module attributes {stable_mosaic.version = 11 : i64} {
  func.func @kernel(%arg0: i32, %arg1: memref<1x128xi8, #tpu.memory_space<vmem>>, %arg2: memref<4x128xf32, #tpu.memory_space<vmem>>) attributes {dimension_semantics = [#tpu.dimension_semantics<parallel>], iteration_bounds = array<i64: 1>, scalar_prefetch = 0 : i64, scratch_operands = 0 : i64, tpu.core_type = #tpu.core_type<tc>, window_params = [{transform_indices = @transform_0, window_bounds = array<i64: 1, 128>}, {transform_indices = @transform_1, window_bounds = array<i64: 4, 128>}]} {
    %c0 = arith.constant 0 : index
    %c0_0 = arith.constant 0 : index
    %0 = vector.load %arg1[%c0, %c0_0] : memref<1x128xi8, #tpu.memory_space<vmem>>, vector<1x128xi8>
    %1 = arith.extsi %0 : vector<1x128xi8> to vector<1x128xi32>
    %c0_i32 = arith.constant 0 : i32
    %2 = vector.broadcast %c0_i32 : i32 to vector<1x128xi32>
    %3 = arith.cmpi eq, %1, %2 : vector<1x128xi32>
    %cst = arith.constant 1.000000e+00 : f32
    %cst_1 = arith.constant 0.000000e+00 : f32
    %4 = vector.broadcast %cst : f32 to vector<1x128xf32>
    %5 = vector.broadcast %cst_1 : f32 to vector<1x128xf32>
    %6 = arith.select %3, %4, %5 : vector<1x128xi1>, vector<1x128xf32>
    %c0_2 = arith.constant 0 : index
    %c0_3 = arith.constant 0 : index
    %7 = vector.load %arg2[%c0_2, %c0_3] : memref<4x128xf32, #tpu.memory_space<vmem>>, vector<1x128xf32>
    tpu.vector_store %arg2[%c0_2, %c0_3], %6 {strides = array<i32>} : memref<4x128xf32, #tpu.memory_space<vmem>>, vector<1x128xf32>,
    %c1_i32 = arith.constant 1 : i32
    %8 = vector.broadcast %c1_i32 : i32 to vector<1x128xi32>
    %9 = arith.cmpi eq, %1, %8 : vector<1x128xi32>
    %cst_4 = arith.constant 1.000000e+00 : f32
    %cst_5 = arith.constant 0.000000e+00 : f32
    %10 = vector.broadcast %cst_4 : f32 to vector<1x128xf32>
    %11 = vector.broadcast %cst_5 : f32 to vector<1x128xf32>
    %12 = arith.select %9, %10, %11 : vector<1x128xi1>, vector<1x128xf32>
    %c1 = arith.constant 1 : index
    %c0_6 = arith.constant 0 : index
    %13 = vector.load %arg2[%c1, %c0_6] : memref<4x128xf32, #tpu.memory_space<vmem>>, vector<1x128xf32>
    tpu.vector_store %arg2[%c1, %c0_6], %12 {strides = array<i32>} : memref<4x128xf32, #tpu.memory_space<vmem>>, vector<1x128xf32>,
    %c2_i32 = arith.constant 2 : i32
    %14 = vector.broadcast %c2_i32 : i32 to vector<1x128xi32>
    %15 = arith.cmpi eq, %1, %14 : vector<1x128xi32>
    %cst_7 = arith.constant 1.000000e+00 : f32
    %cst_8 = arith.constant 0.000000e+00 : f32
    %16 = vector.broadcast %cst_7 : f32 to vector<1x128xf32>
    %17 = vector.broadcast %cst_8 : f32 to vector<1x128xf32>
    %18 = arith.select %15, %16, %17 : vector<1x128xi1>, vector<1x128xf32>
    %c2 = arith.constant 2 : index
    %c0_9 = arith.constant 0 : index
    %19 = vector.load %arg2[%c2, %c0_9] : memref<4x128xf32, #tpu.memory_space<vmem>>, vector<1x128xf32>
    tpu.vector_store %arg2[%c2, %c0_9], %18 {strides = array<i32>} : memref<4x128xf32, #tpu.memory_space<vmem>>, vector<1x128xf32>,
    %c3_i32 = arith.constant 3 : i32
    %20 = vector.broadcast %c3_i32 : i32 to vector<1x128xi32>
    %21 = arith.cmpi eq, %1, %20 : vector<1x128xi32>
    %cst_10 = arith.constant 1.000000e+00 : f32
    %cst_11 = arith.constant 0.000000e+00 : f32
    %22 = vector.broadcast %cst_10 : f32 to vector<1x128xf32>
    %23 = vector.broadcast %cst_11 : f32 to vector<1x128xf32>
    %24 = arith.select %21, %22, %23 : vector<1x128xi1>, vector<1x128xf32>
    %c3 = arith.constant 3 : index
    %c0_12 = arith.constant 0 : index
    %25 = vector.load %arg2[%c3, %c0_12] : memref<4x128xf32, #tpu.memory_space<vmem>>, vector<1x128xf32>
    tpu.vector_store %arg2[%c3, %c0_12], %24 {strides = array<i32>} : memref<4x128xf32, #tpu.memory_space<vmem>>, vector<1x128xf32>,
    return
  }
  func.func @transform_0(%arg0: i32) -> (i32, i32) {
    %c0_i32 = arith.constant 0 : i32
    %c0_i32_0 = arith.constant 0 : i32
    return %c0_i32, %arg0 : i32, i32
  }
  func.func @transform_1(%arg0: i32) -> (i32, i32) {
    %c0_i32 = arith.constant 0 : i32
    %c0_i32_0 = arith.constant 0 : i32
    return %c0_i32, %arg0 : i32, i32
  }
}

</mosaic_0001>

<bundles_post_ra>
// kernel: _seq2tensor_device.1
= control target key start
LH: loop header
LB: loop body
LE: loop exit
PB: predicated region body
PF: predicated region fallthrough
CT: control target
= control target key end

     0   :  { %6 = vsyncpa [#allocation3], 0  ;;  %s116_s0 = inlined_call_operand.hbm [shape: s8[1,128], index: 0, kind: input, shape index: {}]   ;;  %s117_s1 = inlined_call_operand.hbm [shape: f32[4,40], index: 1, kind: output, shape index: {}]  }
   0x1   :  { %7 = vsyncpa [#allocation4], 0  ;;  %s97_s6 = smov [#allocation2]  }
   0x2   :  { %s14_s7 = sshll.u32 %s97_s6, 4  ;;  %s15_s7 = int_to_ptr.vmem [resolvable:$true] %s14_s7 }
   0x3   :  { %s61_s8 = scalar_lea.vmem %s15_s7, 16  ;;  %s65_s9 = scalar_lea.vmem %s15_s7, 32 }
   0x4   :  { %p62_p0 = scmp.ne.s32.totalorder %s15_s7, %s61_s8  ;;  %p66_p1 = scmp.lt.s32.totalorder %s15_s7, %s15_s7 }
   0x5   :  { %p67_p2 = scmp.lt.s32.totalorder %s65_s9, %s61_s8 }
   0x7   :  { %p68_p3 = por %p67_p2, %p66_p1 }
   0x9   :  { %p69_p4 = pnand %p68_p3, %p62_p0 }
   0xb   :  { %72 = shalt.err (!%p69_p4)
}
   0xc   :  { %17 = dma.hbm_to_vmem [thread:$0]  %s116_s0, 16, %s15_s7, [#allocation3]  }
   0xd   :  { %93 = dma.done.wait [#allocation3], 16  }
   0xe   :  { %94 = vsyncadd [#allocation3], 4294967280  ;;  %v21_v0 = vld [vmem:[#allocation2] sm:$0x1]  ;;  %s98_s12 = smov [#allocation5]   ;;  %v99_v2 = vmov 0.0  }
   0xf   :  { %s41_s13 = sshll.u32 %s98_s12, 4  ;;  %v22_v1 = vunpack.c.0.s8 %v21_v0  ;;  %s42_s13 = int_to_ptr.vmem [resolvable:$true] %s41_s13 }
  0x10   :  { %s73_s0 = scalar_lea.vmem %s42_s13, 64  ;;  %p78_p6 = scmp.lt.s32.totalorder %s42_s13, %s42_s13 }
  0x11   :  { %vm23_vm0 = vcmp.eq.s32.totalorder %v22_v1, 0  ;;  %vm26_vm1 = vcmp.eq.s32.totalorder %v22_v1, 1  ;;  %vm29_vm2 = vcmp.eq.s32.totalorder %v22_v1, 2  ;;  %vm32_vm3 = vcmp.eq.s32.totalorder %v22_v1, 3  ;;  %p74_p5 = scmp.ne.s32.totalorder %s42_s13, %s73_s0  ;;  %p79_p7 = scmp.lt.s32.totalorder %s73_s0, %s73_s0 }
  0x12   :  { %v24_v3 = vsel %vm23_vm0, 1.0, %v99_v2  ;;  %v27_v4 = vsel %vm26_vm1, 1.0, %v99_v2  ;;  %v30_v5 = vsel %vm29_vm2, 1.0, %v99_v2  ;;  %v33_v6 = vsel %vm32_vm3, 1.0, %v99_v2 }
  0x13   :  { %25 = vst [vmem:[#allocation5] sm:$0x1] %v24_v3  ;;  %28 = vst [vmem:[#allocation5 + $0x1] sm:$0x1] %v27_v4  ;;  %p80_p8 = por %p79_p7, %p78_p6 }
  0x14   :  { %31 = vst [vmem:[#allocation5 + $0x2] sm:$0x1] %v30_v5  ;;  %34 = vst [vmem:[#allocation5 + $0x3] sm:$0x1] %v33_v6 }
  0x15   :  { %p81_p9 = pnand %p80_p8, %p74_p5 }
  0x17   :  { %84 = shalt.err (!%p81_p9)
}
  0x18   :  { %44 = dma.vmem_to_hbm [thread:$0]  %s42_s13, 64, %s117_s1, [#allocation4]  }
  0x19   :  { %95 = dma.done.wait [#allocation4], 64  }
  0x1a   :  { %96 = vsyncadd [#allocation4], 4294967232 }
  0x1b   :  { %48 = vsyncpa [#allocation3], 1 }
  0x1c   :  { %49 = vsyncpa [#allocation4], 1 }

</bundles_post_ra>
